<compile_context>
chip_gen: v5e
topology: v5e:2x2
jax: 0.10.0
libtpu: 0.0.40
codegen_flags: <defaults>
</compile_context>

<pallas_src>
import jax
import jax.numpy as jnp
from jax import lax
from jax.experimental import pallas as pl
from jax.experimental.pallas import tpu as pltpu


def _round_up(x, m):
    return ((x + m - 1) // m) * m


def _vmem_limit_bytes():
    """~3/4 of physical VMEM (128 MiB v5e/v6e, 64 MiB per-TC v7x)."""
    try:
        cap = int(pltpu.get_tpu_info().vmem_capacity_bytes)
    except Exception:
        cap = 64 * 1024 * 1024          # safe floor (v7x per-TensorCore)
    cap = min(cap, 128 * 1024 * 1024)
    return (cap // 4) * 3


def _centroid_kernel(lab_ref, h_ref, cent_ref, cnt_ref):
    """Accumulate per-class sums directly into the resident output block."""
    i = pl.program_id(1)                                  # reduction over N tiles

    @pl.when(i == 0)
    def _():
        cent_ref[...] = jnp.zeros_like(cent_ref)
        cnt_ref[...] = jnp.zeros_like(cnt_ref)

    lab = lab_ref[...]                                    # (1, TN) int32; -1 => ignore row
    k_pad, tn = cent_ref.shape[0], lab.shape[1]
    # Build the transposed one-hot in-registers: no (K, N) operand ever hits HBM.
    oh_t = (lax.broadcasted_iota(jnp.int32, (k_pad, tn), 0) == lab).astype(jnp.float32)
    h = h_ref[...]                                        # (TN, TD) f32
    cent_ref[...] += jnp.dot(oh_t, h, preferred_element_type=jnp.float32)
    cnt_ref[...] += jnp.sum(oh_t, axis=1, keepdims=True)  # (K_pad, 1)

    @pl.when(i == pl.num_programs(1) - 1)
    def _():
        cnt = cnt_ref[...]                                # (K_pad, 1)
        cent_ref[...] = jnp.where(cnt > 0.0,
                                  cent_ref[...] / jnp.maximum(cnt, 1.0),
                                  0.0)                    # missing clusters -> 0


def _scores_kernel(q_ref, c_ref, out_ref):
    """scores[q, k] = 1 / (||query_q - centroid_k|| + 1e-10) for one query tile."""
    q = q_ref[...]                                        # (TQ, D)  f32
    c = c_ref[...]                                        # (K_pad, D) f32
    qsq = jnp.sum(q * q, axis=1, keepdims=True)           # (TQ, 1)
    # ||c||^2 as a lane-major row vector via a tiny MXU dot (no sublane->lane relayout).
    ones = jnp.ones((1, c.shape[1]), jnp.float32)
    csq = lax.dot_general(ones, c * c, (((1,), (1,)), ((), ())),
                          preferred_element_type=jnp.float32)      # (1, K_pad)
    gram = lax.dot_general(q, c, (((1,), (1,)), ((), ())),
                           preferred_element_type=jnp.float32)     # (TQ, K_pad)
    d2 = jnp.maximum(qsq + csq - 2.0 * gram, 0.0)
    # 1/(sqrt(d2)+1e-10) ~= rsqrt(d2+1e-20): single EUP op, same 1e10 cap at d2=0.
    out_ref[...] = lax.rsqrt(d2 + 1e-20).astype(out_ref.dtype)


def multiclass_prototypical_forward(hidden_vectors, labels, known_attacks_count,
                                    query_mask):
    """JAX/Pallas port of MulticlassPrototypicalClassifier.forward.

    hidden_vectors: (N, D) float32
    labels:         (N, 1) or (N,) integer class ids
    known_attacks_count: python int (n_way)
    query_mask:     (N,) bool
    Returns scores of shape (n_query, n_way).
    """
    hidden_vectors = jnp.asarray(hidden_vectors, jnp.float32)
    n, d = hidden_vectors.shape
    k = int(known_attacks_count)
    k_pad = _round_up(max(k, 1), 128)          # lane-dense scores / full MXU rows
    query_mask = jnp.asarray(query_mask, bool).reshape(-1)

    vmem_limit = _vmem_limit_bytes()

    # Labels per row; query rows and padded rows get -1 so their one-hot is zero.
    lab = jnp.reshape(labels, (-1,)).astype(jnp.int32)
    lab = jnp.where(query_mask, -1, lab)

    # ---------------- centroid kernel tiling ----------------
    # Split D into 2 "parallel" blocks when possible so v7x's second TensorCore
    # gets its own half of the hidden stream; on 1-TC chips it is just 2 steps.
    if d % 256 == 0:
        td, nd = d // 2, 2
    else:
        td, nd = d, 1
    resident = (2 * k_pad * td + k_pad) * 4                 # output block + counts
    budget = max(vmem_limit - resident, 2 * 1024 * 1024)
    tn = min(1024, _round_up(n, 128))
    while tn > 128 and 2 * tn * (td + 1) * 4 > budget:      # double-buffered inputs
        tn -= 128
    n_pad = _round_up(n, tn)
    if n_pad != n:                                          # pad instead of untiled fallback
        hidden_pad = jnp.pad(hidden_vectors, ((0, n_pad - n), (0, 0)))
        lab = jnp.pad(lab, (0, n_pad - n), constant_values=-1)
    else:
        hidden_pad = hidden_vectors
    lab = lab.reshape(1, n_pad)

    centroids = pl.pallas_call(
        _centroid_kernel,
        out_shape=jax.ShapeDtypeStruct((k_pad, d), jnp.float32),
        grid_spec=pltpu.PrefetchScalarGridSpec(
            num_scalar_prefetch=0,
            grid=(nd, n_pad // tn),
            in_specs=[
                pl.BlockSpec((1, tn), lambda j, i: (0, i)),     # labels
                pl.BlockSpec((tn, td), lambda j, i: (i, j)),    # hidden
            ],
            out_specs=pl.BlockSpec((k_pad, td), lambda j, i: (0, j)),
            scratch_shapes=[pltpu.VMEM((k_pad, 1), jnp.float32)],
        ),
        compiler_params=pltpu.CompilerParams(
            dimension_semantics=("parallel", "arbitrary"),
            vmem_limit_bytes=vmem_limit,
        ),
    )(lab, hidden_pad)                                      # (K_pad, D), rows >= k are 0

    # ---------------- query rows ----------------
    # TODO(synk): dynamic-shape boolean gather; under jit replace with
    # scalar-prefetched query row indices + an Element row-gather BlockSpec.
    queries = hidden_vectors[query_mask]
    q = queries.shape[0]
    if q == 0:
        return jnp.zeros((0, k), jnp.float32)

    q8 = _round_up(q, 8)
    tq = min(512, q8)
    if q8 >= 16 and q8 // tq < 2:                           # >=2 tiles for v7x megacore
        tq = _round_up(q8 // 2, 8)
    budget_s = max(vmem_limit - 2 * k_pad * d * 4, 2 * 1024 * 1024)
    while tq > 8 and 2 * tq * (d + k_pad) * 4 > budget_s:
        tq -= 8
    q_pad = _round_up(q, tq)
    if q_pad != q:
        queries = jnp.pad(queries, ((0, q_pad - q), (0, 0)))

    scores = pl.pallas_call(
        _scores_kernel,
        out_shape=jax.ShapeDtypeStruct((q_pad, k_pad), jnp.float32),
        grid_spec=pltpu.PrefetchScalarGridSpec(
            num_scalar_prefetch=0,
            grid=(q_pad // tq,),
            in_specs=[
                pl.BlockSpec((tq, d), lambda i: (i, 0)),
                pl.BlockSpec((k_pad, d), lambda i: (0, 0)),
            ],
            out_specs=pl.BlockSpec((tq, k_pad), lambda i: (i, 0)),
        ),
        compiler_params=pltpu.CompilerParams(
            dimension_semantics=("parallel",),
            vmem_limit_bytes=vmem_limit,
        ),
    )(queries, centroids)
    return scores[:q, :k]


def reference_forward(hidden_vectors, labels, known_attacks_count, query_mask):
    """Pure-JAX reference mirroring the PyTorch module."""
    k = int(known_attacks_count)
    oh = jax.nn.one_hot(jnp.reshape(labels, (-1,)).astype(jnp.int32), k,
                        dtype=jnp.float32)
    support = jnp.logical_not(query_mask)
    h_sup = hidden_vectors[support]
    oh_sup = oh[support]
    cluster_agg = oh_sup.T @ h_sup
    counts = oh_sup.sum(0)
    missing = counts == 0
    centroids = jnp.where(missing[:, None], 0.0,
                          cluster_agg / jnp.maximum(counts, 1.0)[:, None])
    queries = hidden_vectors[query_mask]
    diff = queries[:, None, :] - centroids[None, :, :]
    dist = jnp.sqrt(jnp.maximum(jnp.sum(diff * diff, axis=-1), 0.0))
    return 1.0 / (dist + 1e-10)


if __name__ == "__main__":
    key = jax.random.PRNGKey(0)
    k_h, k_l = jax.random.split(key)

    n_nodes, features = 16, 32
    known_attacks_count = 8                      # classes 6 and 7 have no samples
    hidden_vectors = jax.random.normal(k_h, (n_nodes, features), dtype=jnp.float32)
    labels = jax.random.randint(k_l, (n_nodes, 1), 0, 6, dtype=jnp.int32)
    query_mask = (jnp.arange(n_nodes) % 2) == 0  # 8 query rows, 8 support rows

    scores = multiclass_prototypical_forward(
        hidden_vectors, labels, known_attacks_count, query_mask)
    scores = jax.block_until_ready(scores)

    ref = reference_forward(hidden_vectors, labels, known_attacks_count, query_mask)
    n_query = int(jnp.sum(query_mask))
    assert scores.shape == (n_query, known_attacks_count)
    assert jnp.allclose(scores, ref, atol=1e-4, rtol=1e-3), (
        float(jnp.max(jnp.abs(scores - ref))))

    print("KERNEL_OK")
</pallas_src>

<mosaic_0001>
module attributes {stable_mosaic.version = 11 : i64} {
  func.func @_centroid_kernel(%arg0: i32, %arg1: i32, %arg2: memref<1x128xi32, #tpu.memory_space<vmem>>, %arg3: memref<128x32xf32, #tpu.memory_space<vmem>>, %arg4: memref<128x32xf32, #tpu.memory_space<vmem>>, %arg5: memref<128x1xf32, #tpu.memory_space<vmem>>) attributes {dimension_semantics = [#tpu.dimension_semantics<parallel>, #tpu.dimension_semantics<arbitrary>], iteration_bounds = array<i64: 1, 1>, scalar_prefetch = 0 : i64, scratch_operands = 1 : i64, tpu.core_type = #tpu.core_type<tc>, window_params = [{transform_indices = @transform_0, window_bounds = array<i64: 1, 128>}, {transform_indices = @transform_1, window_bounds = array<i64: 128, 32>}, {transform_indices = @transform_2, window_bounds = array<i64: 128, 32>}]} {
    %c0_i32 = arith.constant 0 : i32
    %0 = arith.cmpi eq, %arg1, %c0_i32 : i32
    %1 = arith.extui %0 : i1 to i32
    %c0_i32_0 = arith.constant 0 : i32
    %2 = arith.cmpi ne, %1, %c0_i32_0 : i32
    scf.if %2 {
      %cst_15 = arith.constant 0.000000e+00 : f32
      %22 = vector.broadcast %cst_15 : f32 to vector<128x32xf32>
      %c0_16 = arith.constant 0 : index
      %c0_17 = arith.constant 0 : index
      %23 = vector.load %arg4[%c0_16, %c0_17] : memref<128x32xf32, #tpu.memory_space<vmem>>, vector<128x32xf32>
      tpu.vector_store %arg4[%c0_16, %c0_17], %22 {strides = array<i32>} : memref<128x32xf32, #tpu.memory_space<vmem>>, vector<128x32xf32>,
      %cst_18 = arith.constant 0.000000e+00 : f32
      %24 = vector.broadcast %cst_18 : f32 to vector<128x1xf32>
      %c0_19 = arith.constant 0 : index
      %c0_20 = arith.constant 0 : index
      %25 = vector.load %arg5[%c0_19, %c0_20] : memref<128x1xf32, #tpu.memory_space<vmem>>, vector<128x1xf32>
      tpu.vector_store %arg5[%c0_19, %c0_20], %24 {strides = array<i32>} : memref<128x1xf32, #tpu.memory_space<vmem>>, vector<128x1xf32>,
    } else {
    }
    %c0 = arith.constant 0 : index
    %c0_1 = arith.constant 0 : index
    %3 = vector.load %arg2[%c0, %c0_1] : memref<1x128xi32, #tpu.memory_space<vmem>>, vector<1x128xi32>
    %4 = tpu.iota {dimensions = array<i32: 0>} : vector<128x128xi32>
    %5 = vector.broadcast %3 : vector<1x128xi32> to vector<128x128xi32>
    %6 = arith.cmpi eq, %4, %5 : vector<128x128xi32>
    %7 = arith.extui %6 : vector<128x128xi1> to vector<128x128xi32>
    %8 = arith.sitofp %7 : vector<128x128xi32> to vector<128x128xf32>
    %c0_2 = arith.constant 0 : index
    %c0_3 = arith.constant 0 : index
    %9 = vector.load %arg3[%c0_2, %c0_3] : memref<128x32xf32, #tpu.memory_space<vmem>>, vector<128x32xf32>
    %c0_4 = arith.constant 0 : index
    %c0_5 = arith.constant 0 : index
    %10 = vector.load %arg4[%c0_4, %c0_5] : memref<128x32xf32, #tpu.memory_space<vmem>>, vector<128x32xf32>
    %cst = arith.constant dense<0.000000e+00> : vector<128x32xf32>
    %11 = tpu.matmul %8, %9, %cst {dimension_numbers = #tpu.dot_dimension_numbers<[1], [0], [0], [1], [0, 0, 1, 1], [], []>} : vector<128x128xf32>, vector<128x32xf32>, vector<128x32xf32> -> vector<128x32xf32>
    %12 = arith.addf %10, %11 : vector<128x32xf32>
    %c0_6 = arith.constant 0 : index
    %c0_7 = arith.constant 0 : index
    %13 = vector.load %arg4[%c0_6, %c0_7] : memref<128x32xf32, #tpu.memory_space<vmem>>, vector<128x32xf32>
    tpu.vector_store %arg4[%c0_6, %c0_7], %12 {strides = array<i32>} : memref<128x32xf32, #tpu.memory_space<vmem>>, vector<128x32xf32>,
    %c0_8 = arith.constant 0 : index
    %c0_9 = arith.constant 0 : index
    %14 = vector.load %arg5[%c0_8, %c0_9] : memref<128x1xf32, #tpu.memory_space<vmem>>, vector<128x1xf32>
    %cst_10 = arith.constant dense<0.000000e+00> : vector<128xf32>
    %15 = vector.multi_reduction <add>, %8, %cst_10 [1] : vector<128x128xf32> to vector<128xf32>
    %16 = vector.shape_cast %15 : vector<128xf32> to vector<128x1xf32>
    %17 = arith.addf %14, %16 : vector<128x1xf32>
    %c0_11 = arith.constant 0 : index
    %c0_12 = arith.constant 0 : index
    %18 = vector.load %arg5[%c0_11, %c0_12] : memref<128x1xf32, #tpu.memory_space<vmem>>, vector<128x1xf32>
    tpu.vector_store %arg5[%c0_11, %c0_12], %17 {strides = array<i32>} : memref<128x1xf32, #tpu.memory_space<vmem>>, vector<128x1xf32>,
    %c0_i32_13 = arith.constant 0 : i32
    %19 = arith.cmpi eq, %arg1, %c0_i32_13 : i32
    %20 = arith.extui %19 : i1 to i32
    %c0_i32_14 = arith.constant 0 : i32
    %21 = arith.cmpi ne, %20, %c0_i32_14 : i32
    scf.if %21 {
      %c0_15 = arith.constant 0 : index
      %c0_16 = arith.constant 0 : index
      %22 = vector.load %arg5[%c0_15, %c0_16] : memref<128x1xf32, #tpu.memory_space<vmem>>, vector<128x1xf32>
      %cst_17 = arith.constant 0.000000e+00 : f32
      %23 = vector.broadcast %cst_17 : f32 to vector<128x1xf32>
      %24 = arith.cmpf ogt, %22, %23 : vector<128x1xf32>
      %c0_18 = arith.constant 0 : index
      %c0_19 = arith.constant 0 : index
      %25 = vector.load %arg4[%c0_18, %c0_19] : memref<128x32xf32, #tpu.memory_space<vmem>>, vector<128x32xf32>
      %cst_20 = arith.constant 1.000000e+00 : f32
      %26 = vector.broadcast %cst_20 : f32 to vector<128x1xf32>
      %27 = arith.maximumf %22, %26 : vector<128x1xf32>
      %28 = vector.broadcast %27 : vector<128x1xf32> to vector<128x32xf32>
      %29 = arith.divf %25, %28 : vector<128x32xf32>
      %cst_21 = arith.constant 0.000000e+00 : f32
      %30 = vector.shape_cast %24 : vector<128x1xi1> to vector<128x1xi1>
      %31 = vector.broadcast %30 : vector<128x1xi1> to vector<128x32xi1>
      %32 = vector.broadcast %cst_21 : f32 to vector<128x32xf32>
      %33 = arith.select %31, %29, %32 : vector<128x32xi1>, vector<128x32xf32>
      %c0_22 = arith.constant 0 : index
      %c0_23 = arith.constant 0 : index
      %34 = vector.load %arg4[%c0_22, %c0_23] : memref<128x32xf32, #tpu.memory_space<vmem>>, vector<128x32xf32>
      tpu.vector_store %arg4[%c0_22, %c0_23], %33 {strides = array<i32>} : memref<128x32xf32, #tpu.memory_space<vmem>>, vector<128x32xf32>,
    } else {
    }
    return
  }
  func.func @transform_0(%arg0: i32, %arg1: i32) -> (i32, i32) {
    %c0_i32 = arith.constant 0 : i32
    %c0_i32_0 = arith.constant 0 : i32
    return %c0_i32, %arg1 : i32, i32
  }
  func.func @transform_1(%arg0: i32, %arg1: i32) -> (i32, i32) {
    %c0_i32 = arith.constant 0 : i32
    return %arg1, %arg0 : i32, i32
  }
  func.func @transform_2(%arg0: i32, %arg1: i32) -> (i32, i32) {
    %c0_i32 = arith.constant 0 : i32
    %c0_i32_0 = arith.constant 0 : i32
    return %c0_i32, %arg0 : i32, i32
  }
}

</mosaic_0001>

<bundles_post_ra>
// kernel: tpu_custom_call.1
= control target key start
LH: loop header
LB: loop body
LE: loop exit
PB: predicated region body
PF: predicated region fallthrough
CT: control target
= control target key end

     0   :  { %v50_v0 = vlaneseq  ;;  %v949_v6 = vmov 0.0   ;;  %vm32_vm12 = vcmask 7168   ;;  %v950_v51 = vmov 1.0   ;;  %s2029_s0 = inlined_call_operand.vmem [shape: s32[1,128], index: 0, kind: input, shape index: {}]   ;;  %s2030_s1 = inlined_call_operand.vmem [shape: f32[128,32], index: 1, kind: input, shape index: {}]   ;;  %s2031_s2 = inlined_call_operand.vmem [shape: f32[128,32], index: 2, kind: output, shape index: {}]  }
   0x1   :  { %v970_v1 = vld [vmem:[%s2029_s0] ss:$0 sm:$0xff]  ;;  %v131_v18 = vld [vmem:[%s2030_s1 + $0x78] sm:$0xff]  ;;  %v130_v19 = vld [vmem:[%s2030_s1 + $0x70] sm:$0xff]  ;;  %33 = vst.msk [vmem:[#allocation2] sm:$0xff] %vm32_vm12, %v949_v6  ;;  %v951_v52 = vmov 0  }
   0x2   :  { %v972_v2 = vshrl.u32 %v50_v0, 7  ;;  %148 = vmatpush.msra.mxu0 %v131_v18  ;;  %862 = vmatpush.msra.mxu1 %v131_v18  ;;  %v129_v20 = vld [vmem:[%s2030_s1 + $0x68] sm:$0xff]  ;;  %v128_v21 = vld [vmem:[%s2030_s1 + $0x60] sm:$0xff]  ;;  %v127_v24 = vld [vmem:[%s2030_s1 + $0x58] sm:$0xff]  ;;  %34 = vst.msk [vmem:[#allocation2 + $0x8] sm:$0xff] %vm32_vm12, %v949_v6 }
   0x3   :  { %863 = vmatpush.msra.mxu2 %v131_v18  ;;  %864 = vmatpush.msra.mxu3 %v131_v18  ;;  %v126_v29 = vld [vmem:[%s2030_s1 + $0x50] sm:$0xff]  ;;  %v1084_v30 = vld [vmem:[%s2030_s1 + $0x48] sm:$0xff]  ;;  %v1093_v31 = vld [vmem:[%s2030_s1 + $0x40] sm:$0xff]  ;;  %35 = vst.msk [vmem:[#allocation2 + $0x10] sm:$0xff] %vm32_vm12, %v949_v6 }
   0x4   :  { %vm68_vm0 = vcmp.eq.s32.totalorder %v972_v2, %v970_v1  ;;  %v977_v3 = vadd.s32 16, %v972_v2  ;;  %v980_v4 = vadd.s32 32, %v972_v2  ;;  %v983_v5 = vadd.s32 8, %v972_v2  ;;  %149 = vmatpush.msra.mxu0 %v130_v19  ;;  %865 = vmatpush.msra.mxu1 %v130_v19  ;;  %v1107_v34 = vld [vmem:[%s2030_s1 + $0x38] sm:$0xff]  ;;  %v1128_v39 = vld [vmem:[%s2030_s1 + $0x30] sm:$0xff]  ;;  %v1139_v40 = vld [vmem:[%s2030_s1 + $0x28] sm:$0xff] }
   0x5   :  { %v830_v7 = vsel %vm68_vm0, 1.0, %v949_v6  ;;  %v994_v8 = vadd.s32 40, %v972_v2  ;;  %v997_v9 = vadd.s32 24, %v972_v2  ;;  %v1018_v13 = vadd.s32 48, %v972_v2  ;;  %866 = vmatpush.msra.mxu2 %v130_v19  ;;  %867 = vmatpush.msra.mxu3 %v130_v19  ;;  %v120_v41 = vld [vmem:[%s2030_s1 + $0x20] sm:$0xff]  ;;  %36 = vst.msk [vmem:[#allocation2 + $0x18] sm:$0xff] %vm32_vm12, %v949_v6 }
   0x6   :  { %262 = vadd.xlane.f32.xlu0 %v830_v7  ;;  %vm70_vm1 = vcmp.eq.s32.totalorder %v977_v3, %v970_v1  ;;  %vm72_vm2 = vcmp.eq.s32.totalorder %v980_v4, %v970_v1  ;;  %vm69_vm3 = vcmp.eq.s32.totalorder %v983_v5, %v970_v1  ;;  %v1029_v16 = vadd.s32 64, %v972_v2  ;;  %150 = vmatpush.msra.mxu0 %v129_v20  ;;  %v119_v44 = vld [vmem:[%s2030_s1 + $0x18] sm:$0xff]  ;;  %v118_v47 = vld [vmem:[%s2030_s1 + $0x10] sm:$0xff]  ;;  %v117_v48 = vld [vmem:[%s2030_s1 + $0x8] sm:$0xff] }
   0x7   :  { %v832_v10 = vsel %vm70_vm1, 1.0, %v949_v6  ;;  %v834_v11 = vsel %vm72_vm2, 1.0, %v949_v6  ;;  %vm73_vm4 = vcmp.eq.s32.totalorder %v994_v8, %v970_v1  ;;  %vm71_vm5 = vcmp.eq.s32.totalorder %v997_v9, %v970_v1  ;;  %868 = vmatpush.msra.mxu1 %v129_v20  ;;  %869 = vmatpush.msra.mxu2 %v129_v20  ;;  %37 = vst.msk [vmem:[#allocation2 + $0x20] sm:$0xff] %vm32_vm12, %v949_v6  ;;  %v116_v49 = vld [vmem:[%s2030_s1] sm:$0xff] }
   0x8   :  { %266 = vadd.xlane.f32.xlu1 %v832_v10  ;;  %270 = vadd.xlane.f32.xlu2 %v834_v11  ;;  %v831_v12 = vsel %vm69_vm3, 1.0, %v949_v6  ;;  %v835_v14 = vsel %vm73_vm4, 1.0, %v949_v6  ;;  %v833_v15 = vsel %vm71_vm5, 1.0, %v949_v6  ;;  %v1032_v17 = vadd.s32 56, %v972_v2  ;;  %38 = vst.msk [vmem:[#allocation2 + $0x28] sm:$0xff] %vm32_vm12, %v949_v6  ;;  %v246_v53 = vld [vmem:[#allocation2] sm:$0xff] }
   0x9   :  { %vm74_vm6 = vcmp.eq.s32.totalorder %v1018_v13, %v970_v1  ;;  %vm76_vm7 = vcmp.eq.s32.totalorder %v1029_v16, %v970_v1  ;;  %v1057_v23 = vadd.s32 72, %v972_v2  ;;  %151 = vmatpush.msra.mxu0 %v128_v21  ;;  %871 = vmatpush.msra.mxu1 %v128_v21  ;;  %v1071_v27 = vadd.s32 88, %v972_v2  ;;  %39 = vst.msk [vmem:[#allocation2 + $0x30] sm:$0xff] %vm32_vm12, %v949_v6  ;;  %v247_v62 = vld [vmem:[#allocation2 + $0x8] sm:$0xff] }
   0xa   :  { %vm75_vm8 = vcmp.eq.s32.totalorder %v1032_v17, %v970_v1  ;;  %v836_v22 = vsel %vm74_vm6, 1.0, %v949_v6  ;;  %v838_v25 = vsel %vm76_vm7, 1.0, %v949_v6  ;;  %v1074_v28 = vadd.s32 80, %v972_v2  ;;  %872 = vmatpush.msra.mxu2 %v128_v21  ;;  %870 = vmatpush.msra.mxu3 %v129_v20  ;;  %40 = vst.msk [vmem:[#allocation2 + $0x38] sm:$0xff] %vm32_vm12, %v949_v6  ;;  %v248_v55 = vld [vmem:[#allocation2 + $0x10] sm:$0xff] }
   0xb   :  { %v837_v26 = vsel %vm75_vm8, 1.0, %v949_v6  ;;  %152 = vmatpush.msra.mxu0 %v127_v24  ;;  %874 = vmatpush.msra.mxu1 %v127_v24  ;;  %vm77_vm9 = vcmp.eq.s32.totalorder %v1057_v23, %v970_v1  ;;  %vm2032_vm10 = vcmp.eq.s32.totalorder %v1071_v27, %v970_v1  ;;  %v1102_v33 = vadd.s32 96, %v972_v2  ;;  %41 = vst.msk [vmem:[#allocation2 + $0x40] sm:$0xff] %vm32_vm12, %v949_v6 }
   0xc   :  { %vm78_vm11 = vcmp.eq.s32.totalorder %v1074_v28, %v970_v1  ;;  %v839_v32 = vsel %vm77_vm9, 1.0, %v949_v6  ;;  %875 = vmatpush.msra.mxu2 %v127_v24  ;;  %873 = vmatpush.msra.mxu3 %v128_v21  ;;  %v841_v35 = vsel %vm2032_vm10, 1.0, %v949_v6  ;;  %v1120_v37 = vadd.s32 112, %v972_v2  ;;  %42 = vst.msk [vmem:[#allocation2 + $0x48] sm:$0xff] %vm32_vm12, %v949_v6 }
   0xd   :  { %153 = vmatpush.msra.mxu0 %v126_v29  ;;  %877 = vmatpush.msra.mxu1 %v126_v29  ;;  %v840_v36 = vsel %vm78_vm11, 1.0, %v949_v6  ;;  %v1123_v38 = vadd.s32 104, %v972_v2  ;;  %vm80_vm13 = vcmp.eq.s32.totalorder %v1102_v33, %v970_v1  ;;  %v1166_v43 = vadd.s32 120, %v972_v2  ;;  %43 = vst.msk [vmem:[#allocation2 + $0x50] sm:$0xff] %vm32_vm12, %v949_v6 }
   0xe   :  { %264 = vadd.xlane.f32.xlu0 %v831_v12  ;;  %878 = vmatpush.msra.mxu2 %v126_v29  ;;  %vm82_vm14 = vcmp.eq.s32.totalorder %v1120_v37, %v970_v1  ;;  %v842_v42 = vsel %vm80_vm13, 1.0, %v949_v6  ;;  %44 = vst.msk [vmem:[#allocation2 + $0x58] sm:$0xff] %vm32_vm12, %v949_v6  ;;  %v250_v56 = vld [vmem:[#allocation2 + $0x20] sm:$0xff] }
   0xf   :  { %154 = vmatpush.msra.mxu0 %v1084_v30  ;;  %880 = vmatpush.msra.mxu1 %v1084_v30  ;;  %vm81_vm15 = vcmp.eq.s32.totalorder %v1123_v38, %v970_v1  ;;  %v844_v45 = vsel %vm82_vm14, 1.0, %v949_v6  ;;  %vm83_vm10 = vcmp.eq.s32.totalorder %v1166_v43, %v970_v1  ;;  %45 = vst.msk [vmem:[#allocation2 + $0x60] sm:$0xff] %vm32_vm12, %v949_v6  ;;  %v251_v0 = vld [vmem:[#allocation2 + $0x28] sm:$0xff] }
  0x10   :  { %272 = vadd.xlane.f32.xlu2 %v835_v14  ;;  %268 = vadd.xlane.f32.xlu1 %v833_v15  ;;  %v843_v46 = vsel %vm81_vm15, 1.0, %v949_v6  ;;  %v845_v50 = vsel %vm83_vm10, 1.0, %v949_v6  ;;  %46 = vst.msk [vmem:[#allocation2 + $0x68] sm:$0xff] %vm32_vm12, %v949_v6  ;;  %v252_v13 = vld [vmem:[#allocation2 + $0x30] sm:$0xff] }
  0x11   :  { %155 = vmatpush.msra.mxu0 %v1093_v31  ;;  %883 = vmatpush.msra.mxu1 %v1093_v31  ;;  %47 = vst.msk [vmem:[#allocation2 + $0x70] sm:$0xff] %vm32_vm12, %v949_v6  ;;  %v253_v17 = vld [vmem:[#allocation2 + $0x38] sm:$0xff] }
  0x12   :  { %881 = vmatpush.msra.mxu2 %v1084_v30  ;;  %876 = vmatpush.msra.mxu3 %v127_v24  ;;  %48 = vst.msk [vmem:[#allocation2 + $0x78] sm:$0xff] %vm32_vm12, %v949_v6  ;;  %v254_v16 = vld [vmem:[#allocation2 + $0x40] sm:$0xff] }
  0x13   :  { %156 = vmatpush.msra.mxu0 %v1107_v34  ;;  %886 = vmatpush.msra.mxu1 %v1107_v34 }
  0x14   :  { %884 = vmatpush.msra.mxu2 %v1093_v31  ;;  %879 = vmatpush.msra.mxu3 %v126_v29 }
  0x15   :  { %157 = vmatpush.msra.mxu0 %v1128_v39  ;;  %889 = vmatpush.msra.mxu1 %v1128_v39  ;;  %v257_v29 = vld [vmem:[#allocation2 + $0x58] sm:$0xff] }
  0x16   :  { %274 = vadd.xlane.f32.xlu0 %v836_v22  ;;  %887 = vmatpush.msra.mxu2 %v1107_v34 }
  0x17   :  { %158 = vmatpush.msra.mxu0 %v1139_v40  ;;  %892 = vmatpush.msra.mxu1 %v1139_v40 }
  0x18   :  { %278 = vadd.xlane.f32.xlu2 %v838_v25  ;;  %276 = vadd.xlane.f32.xlu1 %v837_v26  ;;  %v255_v26 = vld [vmem:[#allocation2 + $0x48] sm:$0xff]  ;;  %v260_v43 = vld [vmem:[#allocation2 + $0x70] sm:$0xff] }
  0x19   :  { %159 = vmatpush.msra.mxu0 %v120_v41  ;;  %895 = vmatpush.msra.mxu1 %v120_v41 }
  0x1a   :  { %890 = vmatpush.msra.mxu2 %v1128_v39  ;;  %882 = vmatpush.msra.mxu3 %v1084_v30  ;;  %v256_v30 = vld [vmem:[#allocation2 + $0x50] sm:$0xff] }
  0x1b   :  { %160 = vmatpush.msra.mxu0 %v119_v44  ;;  %898 = vmatpush.msra.mxu1 %v119_v44 }
  0x1c   :  { %893 = vmatpush.msra.mxu2 %v1139_v40  ;;  %885 = vmatpush.msra.mxu3 %v1093_v31 }
  0x1d   :  { %161 = vmatpush.msra.mxu0 %v118_v47  ;;  %901 = vmatpush.msra.mxu1 %v118_v47 }
  0x1e   :  { %280 = vadd.xlane.f32.xlu0 %v839_v32  ;;  %896 = vmatpush.msra.mxu2 %v120_v41 }
  0x1f   :  { %162 = vmatpush.msra.mxu0 %v117_v48  ;;  %904 = vmatpush.msra.mxu1 %v117_v48 }
  0x20   :  { %284 = vadd.xlane.f32.xlu2 %v841_v35  ;;  %282 = vadd.xlane.f32.xlu1 %v840_v36 }
  0x21   :  { %163 = vmatpush.msra.mxu0 %v116_v49  ;;  %907 = vmatpush.msra.mxu1 %v116_v49 }
  0x22   :  { %846 = vmatmul.msk.f32.vlgmr.msra.gmra.mxu0 %vm68_vm0, %v950_v51  ;;  %850 = vmatmul.msk.f32.vlgmr.msra.gmra.mxu1 %vm72_vm2, %v950_v51  ;;  %vm2033_vm0 = vcmp.eq.s32.totalorder %v1071_v27, %v970_v1  ;;  %v249_v1 = vld [vmem:[#allocation2 + $0x18] sm:$0xff] }
  0x23   :  { %888 = vmatpush.msra.mxu3 %v1107_v34  ;;  %899 = vmatpush.msra.mxu2 %v119_v44 }
  0x24   :  { %914 = vset.pattern.permute.xlu2 %v951_v52  ;;  %913 = vset.pattern.permute.xlu1 %v951_v52 }
  0x25   :  { %891 = vmatpush.msra.mxu3 %v1128_v39  ;;  %902 = vmatpush.msra.mxu2 %v118_v47  ;;  %v258_v39 = vld [vmem:[#allocation2 + $0x60] sm:$0xff] }
  0x26   :  { %286 = vadd.xlane.f32.xlu0 %v842_v42 }
  0x27   :  { %894 = vmatpush.msra.mxu3 %v1139_v40  ;;  %905 = vmatpush.msra.mxu2 %v117_v48 }
  0x28   :  { %290 = vadd.xlane.f32.xlu2 %v844_v45  ;;  %288 = vadd.xlane.f32.xlu1 %v843_v46 }
  0x29   :  { %897 = vmatpush.msra.mxu3 %v120_v41  ;;  %908 = vmatpush.msra.mxu2 %v116_v49 }
  0x2a   :  { %847 = vmatmul.msk.f32.gmra.mxu0 %vm69_vm3, %v950_v51  ;;  %851 = vmatmul.msk.f32.gmra.mxu1 %vm73_vm4, %v950_v51 }
  0x2b   :  { %854 = vmatmul.msk.f32.vlgmr.msra.gmra.mxu2 %vm76_vm7, %v950_v51  ;;  %900 = vmatpush.msra.mxu3 %v119_v44  ;;  %v259_v44 = vld [vmem:[#allocation2 + $0x68] sm:$0xff]  ;;  %vm15_vm7 = vcmask 261120  }
  0x2c   :  { %915 = vset.pattern.permute.xlu0 %v951_v52  ;;  %16 = vst.msk [vmem:[%s2031_s2] sm:$0xff] %vm15_vm7, %v949_v6 }
  0x2d   :  { %903 = vmatpush.msra.mxu3 %v118_v47  ;;  %17 = vst.msk [vmem:[%s2031_s2 + $0x8] sm:$0xff] %vm15_vm7, %v949_v6 }
  0x2e   :  { %292 = vadd.xlane.f32.xlu0 %v845_v50  ;;  %18 = vst.msk [vmem:[%s2031_s2 + $0x10] sm:$0xff] %vm15_vm7, %v949_v6 }
  0x2f   :  { %906 = vmatpush.msra.mxu3 %v117_v48  ;;  %19 = vst.msk [vmem:[%s2031_s2 + $0x18] sm:$0xff] %vm15_vm7, %v949_v6 }
  0x30   :  { %20 = vst.msk [vmem:[%s2031_s2 + $0x20] sm:$0xff] %vm15_vm7, %v949_v6 }
  0x31   :  { %909 = vmatpush.msra.mxu3 %v116_v49  ;;  %21 = vst.msk [vmem:[%s2031_s2 + $0x28] sm:$0xff] %vm15_vm7, %v949_v6 }
  0x32   :  { %848 = vmatmul.msk.f32.gmra.mxu0 %vm70_vm1, %v950_v51  ;;  %852 = vmatmul.msk.f32.gmra.mxu1 %vm74_vm6, %v950_v51  ;;  %22 = vst.msk [vmem:[%s2031_s2 + $0x30] sm:$0xff] %vm15_vm7, %v949_v6 }
  0x33   :  { %858 = vmatmul.msk.f32.vlgmr.msra.gmra.mxu3 %vm80_vm13, %v950_v51  ;;  %855 = vmatmul.msk.f32.gmra.mxu2 %vm77_vm9, %v950_v51  ;;  %23 = vst.msk [vmem:[%s2031_s2 + $0x38] sm:$0xff] %vm15_vm7, %v949_v6 }
  0x34   :  { %24 = vst.msk [vmem:[%s2031_s2 + $0x40] sm:$0xff] %vm15_vm7, %v949_v6 }
  0x35   :  { %25 = vst.msk [vmem:[%s2031_s2 + $0x48] sm:$0xff] %vm15_vm7, %v949_v6 }
  0x36   :  { %26 = vst.msk [vmem:[%s2031_s2 + $0x50] sm:$0xff] %vm15_vm7, %v949_v6 }
  0x37   :  { %27 = vst.msk [vmem:[%s2031_s2 + $0x58] sm:$0xff] %vm15_vm7, %v949_v6 }
  0x38   :  { %28 = vst.msk [vmem:[%s2031_s2 + $0x60] sm:$0xff] %vm15_vm7, %v949_v6 }
  0x39   :  { %29 = vst.msk [vmem:[%s2031_s2 + $0x68] sm:$0xff] %vm15_vm7, %v949_v6 }
  0x3a   :  { %849 = vmatmul.msk.f32.gmra.mxu0 %vm71_vm5, %v950_v51  ;;  %853 = vmatmul.msk.f32.gmra.mxu1 %vm75_vm8, %v950_v51  ;;  %30 = vst.msk [vmem:[%s2031_s2 + $0x70] sm:$0xff] %vm15_vm7, %v949_v6 }
  0x3b   :  { %859 = vmatmul.msk.f32.gmra.mxu3 %vm81_vm15, %v950_v51  ;;  %856 = vmatmul.msk.f32.gmra.mxu2 %vm78_vm11, %v950_v51  ;;  %31 = vst.msk [vmem:[%s2031_s2 + $0x78] sm:$0xff] %vm15_vm7, %v949_v6  ;;  %v136_v6 = vld [vmem:[%s2031_s2 + $0x20] sm:$0xff] }
  0x43   :  { %860 = vmatmul.msk.f32.gmra.mxu3 %vm82_vm14, %v950_v51  ;;  %857 = vmatmul.msk.f32.gmra.mxu2 %vm2033_vm0, %v950_v51 }
  0x4b   :  { %861 = vmatmul.msk.f32.gmra.mxu3 %vm83_vm10, %v950_v51 }
  0x79   :  { %v263_v54 = vpop.xlane.xlu0 %262 }
  0x7a   :  { %v294_v57 = vadd.f32 %v263_v54, %v246_v53 }
  0x7b   :  { %v267_v58 = vpop.xlane.xlu1 %266  ;;  %v271_v59 = vpop.xlane.xlu2 %270 }
  0x7c   :  { %311 = vst.msk [vmem:[#allocation2] sm:$0xff] %vm32_vm12, %v294_v57  ;;  %v296_v60 = vadd.f32 %v267_v58, %v248_v55  ;;  %v298_v61 = vadd.f32 %v271_v59, %v250_v56  ;;  %v261_v55 = vld [vmem:[#allocation2 + $0x78] sm:$0xff] }
  0x7e   :  { %313 = vst.msk [vmem:[#allocation2 + $0x10] sm:$0xff] %vm32_vm12, %v296_v60 }
  0x7f   :  { %315 = vst.msk [vmem:[#allocation2 + $0x20] sm:$0xff] %vm32_vm12, %v298_v61 }
  0x81   :  { %v265_v63 = vpop.xlane.xlu0 %264 }
  0x82   :  { %v295_v2 = vadd.f32 %v265_v63, %v247_v62 }
  0x83   :  { %v330_v3 = vld [vmem:[#allocation2] sm:$0xff]  ;;  %v273_v4 = vpop.xlane.xlu2 %272  ;;  %v269_v5 = vpop.xlane.xlu1 %268 }
  0x84   :  { %312 = vst.msk [vmem:[#allocation2 + $0x8] sm:$0xff] %vm32_vm12, %v295_v2  ;;  %v378_v7 = vmax.f32 %v330_v3, 1.0  ;;  %vm346_vm1 = vcmp.gt.f32.partialorder %v330_v3, 0.0  ;;  %v299_v8 = vadd.f32 %v273_v4, %v251_v0  ;;  %v297_v9 = vadd.f32 %v269_v5, %v249_v1 }
  0x85   :  { %v714_v10 = vsel %vm346_vm1, 1, %v951_v52  ;;  %v1281_v11 = vld [vmem:[#allocation2 + $0x10] sm:$0xff] }
  0x86   :  { %396 = vperm.xlu1 %913, %v378_v7   ;;  %731 = vperm.xlu2 %914, %v714_v10   ;;  %316 = vst.msk [vmem:[#allocation2 + $0x28] sm:$0xff] %vm32_vm12, %v299_v8  ;;  %v380_v12 = vmax.f32 %v1281_v11, 1.0  ;;  %v1286_v14 = vld [vmem:[#allocation2 + $0x20] sm:$0xff]  ;;  %vm348_vm3 = vcmp.gt.f32.partialorder %v1281_v11, 0.0 }
  0x87   :  { %314 = vst.msk [vmem:[#allocation2 + $0x18] sm:$0xff] %vm32_vm12, %v297_v9  ;;  %v382_v19 = vmax.f32 %v1286_v14, 1.0  ;;  %v716_v10 = vsel %vm348_vm3, 1, %v951_v52  ;;  %vm350_vm5 = vcmp.gt.f32.partialorder %v1286_v14, 0.0 }
  0x88   :  { %406 = vperm.xlu0 %915, %v380_v12  }
  0x89   :  { %v275_v15 = vpop.xlane.xlu0 %274 }
  0x8a   :  { %v300_v18 = vadd.f32 %v275_v15, %v252_v13  ;;  %v718_v13 = vsel %vm350_vm5, 1, %v951_v52 }
  0x8b   :  { %v1289_v20 = vld [vmem:[#allocation2 + $0x8] sm:$0xff]  ;;  %v279_v21 = vpop.xlane.xlu2 %278  ;;  %v277_v22 = vpop.xlane.xlu1 %276 }
  0x8c   :  { %317 = vst.msk [vmem:[#allocation2 + $0x30] sm:$0xff] %vm32_vm12, %v300_v18  ;;  %v379_v23 = vmax.f32 %v1289_v20, 1.0  ;;  %v302_v24 = vadd.f32 %v279_v21, %v254_v16  ;;  %v301_v25 = vadd.f32 %v277_v22, %v253_v17  ;;  %vm347_vm2 = vcmp.gt.f32.partialorder %v1289_v20, 0.0  ;;  %v132_v18 = vld [vmem:[%s2031_s2] sm:$0xff]  ;;  %v133_v21 = vld [vmem:[%s2031_s2 + $0x8] sm:$0xff] }
  0x8d   :  { %v335_v42 = vld [vmem:[#allocation2 + $0x28] sm:$0xff]  ;;  %v715_v9 = vsel %vm347_vm2, 1, %v951_v52 }
  0x8e   :  { %416 = vperm.xlu1 %913, %v382_v19   ;;  %401 = vperm.xlu2 %914, %v379_v23   ;;  %319 = vst.msk [vmem:[#allocation2 + $0x40] sm:$0xff] %vm32_vm12, %v302_v24  ;;  %v1294_v27 = vld [vmem:[#allocation2 + $0x18] sm:$0xff]  ;;  %v383_v50 = vmax.f32 %v335_v42, 1.0  ;;  %vm351_vm6 = vcmp.gt.f32.partialorder %v335_v42, 0.0 }
  0x8f   :  { %318 = vst.msk [vmem:[#allocation2 + $0x38] sm:$0xff] %vm32_vm12, %v301_v25  ;;  %v381_v32 = vmax.f32 %v1294_v27, 1.0  ;;  %vm349_vm4 = vcmp.gt.f32.partialorder %v1294_v27, 0.0  ;;  %v719_v11 = vsel %vm351_vm6, 1, %v951_v52 }
  0x90   :  { %v717_v12 = vsel %vm349_vm4, 1, %v951_v52 }
  0x91   :  { %v281_v28 = vpop.xlane.xlu0 %280 }
  0x92   :  { %v303_v31 = vadd.f32 %v281_v28, %v255_v26  ;;  %v134_v28 = vld [vmem:[%s2031_s2 + $0x10] sm:$0xff] }
  0x93   :  { %v1298_v33 = vld [vmem:[#allocation2 + $0x30] sm:$0xff]  ;;  %v285_v34 = vpop.xlane.xlu2 %284  ;;  %v283_v35 = vpop.xlane.xlu1 %282 }
  0x94   :  { %320 = vst.msk [vmem:[#allocation2 + $0x48] sm:$0xff] %vm32_vm12, %v303_v31  ;;  %v384_v36 = vmax.f32 %v1298_v33, 1.0  ;;  %v305_v37 = vadd.f32 %v285_v34, %v257_v29  ;;  %v304_v38 = vadd.f32 %v283_v35, %v256_v30  ;;  %vm352_vm9 = vcmp.gt.f32.partialorder %v1298_v33, 0.0  ;;  %v135_v34 = vld [vmem:[%s2031_s2 + $0x18] sm:$0xff] }
  0x95   :  { %v1303_v40 = vld [vmem:[#allocation2 + $0x40] sm:$0xff]  ;;  %v720_v16 = vsel %vm352_vm9, 1, %v951_v52 }
  0x96   :  { %411 = vperm.xlu2 %914, %v381_v32   ;;  %426 = vperm.xlu1 %913, %v384_v36   ;;  %322 = vst.msk [vmem:[#allocation2 + $0x58] sm:$0xff] %vm32_vm12, %v305_v37  ;;  %v386_v46 = vmax.f32 %v1303_v40, 1.0  ;;  %v337_v56 = vld [vmem:[#allocation2 + $0x38] sm:$0xff]  ;;  %vm354_vm10 = vcmp.gt.f32.partialorder %v1303_v40, 0.0 }
  0x97   :  { %321 = vst.msk [vmem:[#allocation2 + $0x50] sm:$0xff] %vm32_vm12, %v304_v38  ;;  %v385_v60 = vmax.f32 %v337_v56, 1.0  ;;  %vm353_vm8 = vcmp.gt.f32.partialorder %v337_v56, 0.0  ;;  %v722_v17 = vsel %vm354_vm10, 1, %v951_v52  ;;  %v137_v38 = vld [vmem:[%s2031_s2 + $0x28] sm:$0xff]  ;;  %v142_v56 = vld [vmem:[%s2031_s2 + $0x50] sm:$0xff] }
  0x98   :  { %v721_v14 = vsel %vm353_vm8, 1, %v951_v52 }
  0x99   :  { %v287_v41 = vpop.xlane.xlu0 %286 }
  0x9a   :  { %v306_v45 = vadd.f32 %v287_v41, %v258_v39 }
  0x9b   :  { %v1307_v47 = vld [vmem:[#allocation2 + $0x48] sm:$0xff]  ;;  %v291_v48 = vpop.xlane.xlu2 %290  ;;  %v289_v49 = vpop.xlane.xlu1 %288 }
  0x9c   :  { %323 = vst.msk [vmem:[#allocation2 + $0x60] sm:$0xff] %vm32_vm12, %v306_v45  ;;  %v387_v51 = vmax.f32 %v1307_v47, 1.0  ;;  %v308_v53 = vadd.f32 %v291_v48, %v260_v43  ;;  %v307_v54 = vadd.f32 %v289_v49, %v259_v44  ;;  %v139_v45 = vld [vmem:[%s2031_s2 + $0x38] sm:$0xff]  ;;  %v138_v48 = vld [vmem:[%s2031_s2 + $0x30] sm:$0xff]  ;;  %v140_v49 = vld [vmem:[%s2031_s2 + $0x40] sm:$0xff] }
  0x9d   :  { %v1312_v57 = vld [vmem:[#allocation2 + $0x58] sm:$0xff] }
  0x9e   :  { %421 = vperm.xlu2 %914, %v383_v50   ;;  %436 = vperm.xlu1 %913, %v386_v46   ;;  %325 = vst.msk [vmem:[#allocation2 + $0x70] sm:$0xff] %vm32_vm12, %v308_v53  ;;  %v389_v61 = vmax.f32 %v1312_v57, 1.0  ;;  %v340_v0 = vld [vmem:[#allocation2 + $0x50] sm:$0xff]  ;;  %vm357_vm13 = vcmp.gt.f32.partialorder %v1312_v57, 0.0  ;;  %v141_v50 = vld [vmem:[%s2031_s2 + $0x48] sm:$0xff] }
  0x9f   :  { %441 = vperm.xlu0 %915, %v387_v51   ;;  %324 = vst.msk [vmem:[#allocation2 + $0x68] sm:$0xff] %vm32_vm12, %v307_v54  ;;  %v388_v2 = vmax.f32 %v340_v0, 1.0  ;;  %v165_v15 = vpop.f32.mrf.mxu0  ;;  %vm356_vm11 = vcmp.gt.f32.partialorder %v340_v0, 0.0  ;;  %v725_v25 = vsel %vm357_vm13, 1, %v951_v52  ;;  %v177_v27 = vpop.f32.mrf.mxu1  ;;  %v145_v0 = vld [vmem:[%s2031_s2 + $0x68] sm:$0xff] }
  0xa0   :  { %v213_v20 = vadd.f32 %v165_v15, %v132_v18  ;;  %v724_v23 = vsel %vm356_vm11, 1, %v951_v52  ;;  %v217_v32 = vadd.f32 %v177_v27, %v136_v6 }
  0xa1   :  { %v293_v58 = vpop.xlane.xlu0 %292 }
  0xa2   :  { %v309_v59 = vadd.f32 %v293_v58, %v261_v55  ;;  %230 = vst.msk [vmem:[%s2031_s2] sm:$0xff] %vm15_vm7, %v213_v20 }
  0xa3   :  { %v1316_v62 = vld [vmem:[#allocation2 + $0x60] sm:$0xff]  ;;  %234 = vst.msk [vmem:[%s2031_s2 + $0x20] sm:$0xff] %vm15_vm7, %v217_v32 }
  0xa4   :  { %326 = vst.msk [vmem:[#allocation2 + $0x78] sm:$0xff] %vm32_vm12, %v309_v59  ;;  %v390_v63 = vmax.f32 %v1316_v62, 1.0  ;;  %vm355_vm12 = vcmp.gt.f32.partialorder %v1307_v47, 0.0  ;;  %vm358_vm15 = vcmp.gt.f32.partialorder %v1316_v62, 0.0 }
  0xa5   :  { %v1320_v1 = vld [vmem:[#allocation2 + $0x70] sm:$0xff]  ;;  %v723_v24 = vsel %vm355_vm12, 1, %v951_v52  ;;  %v726_v30 = vsel %vm358_vm15, 1, %v951_v52 }
  0xa6   :  { %431 = vperm.xlu2 %914, %v385_v60   ;;  %451 = vperm.xlu1 %913, %v389_v61   ;;  %v392_v3 = vmax.f32 %v1320_v1, 1.0  ;;  %v1326_v7 = vld [vmem:[#allocation2 + $0x68] sm:$0xff]  ;;  %vm360_vm0 = vcmp.gt.f32.partialorder %v1320_v1, 0.0  ;;  %v144_v60 = vld [vmem:[%s2031_s2 + $0x60] sm:$0xff] }
  0xa7   :  { %456 = vperm.xlu0 %915, %v390_v63   ;;  %v391_v8 = vmax.f32 %v1326_v7, 1.0  ;;  %v168_v19 = vpop.f32.mrf.mxu0  ;;  %vm359_vm14 = vcmp.gt.f32.partialorder %v1326_v7, 0.0  ;;  %v728_v33 = vsel %vm360_vm0, 1, %v951_v52  ;;  %v180_v36 = vpop.f32.mrf.mxu1 }
  0xa8   :  { %v214_v22 = vadd.f32 %v168_v19, %v133_v21  ;;  %v727_v29 = vsel %vm359_vm14, 1, %v951_v52  ;;  %v218_v40 = vadd.f32 %v180_v36, %v137_v38 }
  0xaa   :  { %231 = vst.msk [vmem:[%s2031_s2 + $0x8] sm:$0xff] %vm15_vm7, %v214_v22 }
  0xab   :  { %v1323_v4 = vld [vmem:[#allocation2 + $0x78] sm:$0xff]  ;;  %235 = vst.msk [vmem:[%s2031_s2 + $0x28] sm:$0xff] %vm15_vm7, %v218_v40 }
  0xac   :  { %v393_v5 = vmax.f32 %v1323_v4, 1.0  ;;  %vm361_vm1 = vcmp.gt.f32.partialorder %v1323_v4, 0.0 }
  0xad   :  { %v729_v39 = vsel %vm361_vm1, 1, %v951_v52 }
  0xae   :  { %446 = vperm.xlu2 %914, %v388_v2   ;;  %466 = vperm.xlu1 %913, %v392_v3   ;;  %v189_v43 = vpop.f32.mrf.mxu2 }
  0xaf   :  { %471 = vperm.xlu0 %915, %v393_v5   ;;  %v171_v26 = vpop.f32.mrf.mxu0  ;;  %v183_v42 = vpop.f32.mrf.mxu1  ;;  %v221_v53 = vadd.f32 %v189_v43, %v140_v49 }
  0xb0   :  { %v215_v31 = vadd.f32 %v171_v26, %v134_v28  ;;  %v219_v51 = vadd.f32 %v183_v42, %v138_v48  ;;  %v362_v26 = vld [vmem:[%s2031_s2] sm:$0xff] }
  0xb1   :  { %238 = vst.msk [vmem:[%s2031_s2 + $0x40] sm:$0xff] %vm15_vm7, %v221_v53 }
  0xb2   :  { %232 = vst.msk [vmem:[%s2031_s2 + $0x10] sm:$0xff] %vm15_vm7, %v215_v31 }
  0xb3   :  { %236 = vst.msk [vmem:[%s2031_s2 + $0x30] sm:$0xff] %vm15_vm7, %v219_v51 }
  0xb6   :  { %461 = vperm.xlu2 %914, %v391_v8   ;;  %734 = vperm.xlu1 %913, %v715_v9   ;;  %v192_v47 = vpop.f32.mrf.mxu2  ;;  %v201_v58 = vpop.f32.mrf.mxu3 }
  0xb7   :  { %737 = vperm.xlu0 %915, %v716_v10   ;;  %v174_v35 = vpop.f32.mrf.mxu0  ;;  %v186_v46 = vpop.f32.mrf.mxu1  ;;  %v222_v54 = vadd.f32 %v192_v47, %v141_v50  ;;  %v225_v61 = vadd.f32 %v201_v58, %v144_v60 }
  0xb8   :  { %v216_v37 = vadd.f32 %v174_v35, %v135_v34  ;;  %v220_v52 = vadd.f32 %v186_v46, %v139_v45 }
  0xb9   :  { %239 = vst.msk [vmem:[%s2031_s2 + $0x48] sm:$0xff] %vm15_vm7, %v222_v54 }
  0xba   :  { %233 = vst.msk [vmem:[%s2031_s2 + $0x18] sm:$0xff] %vm15_vm7, %v216_v37  ;;  %v147_v37 = vld [vmem:[%s2031_s2 + $0x78] sm:$0xff] }
  0xbb   :  { %237 = vst.msk [vmem:[%s2031_s2 + $0x38] sm:$0xff] %vm15_vm7, %v220_v52 }
  0xbc   :  { %242 = vst.msk [vmem:[%s2031_s2 + $0x60] sm:$0xff] %vm15_vm7, %v225_v61  ;;  %v363_v61 = vld [vmem:[%s2031_s2 + $0x8] sm:$0xff] }
  0xbe   :  { %740 = vperm.xlu2 %914, %v717_v12   ;;  %743 = vperm.xlu1 %913, %v718_v13   ;;  %v195_v57 = vpop.f32.mrf.mxu2  ;;  %v204_v1 = vpop.f32.mrf.mxu3  ;;  %v143_v13 = vld [vmem:[%s2031_s2 + $0x58] sm:$0xff] }
  0xbf   :  { %746 = vperm.xlu0 %915, %v719_v11   ;;  %v223_v59 = vadd.f32 %v195_v57, %v142_v56  ;;  %v226_v3 = vadd.f32 %v204_v1, %v145_v0 }
  0xc1   :  { %240 = vst.msk [vmem:[%s2031_s2 + $0x50] sm:$0xff] %vm15_vm7, %v223_v59 }
  0xc2   :  { %243 = vst.msk [vmem:[%s2031_s2 + $0x68] sm:$0xff] %vm15_vm7, %v226_v3 }
  0xc6   :  { %752 = vperm.xlu1 %913, %v721_v14   ;;  %749 = vperm.xlu2 %914, %v720_v16   ;;  %v198_v11 = vpop.f32.mrf.mxu2  ;;  %v207_v15 = vpop.f32.mrf.mxu3 }
  0xc7   :  { %755 = vperm.xlu0 %915, %v722_v17   ;;  %v224_v19 = vadd.f32 %v198_v11, %v143_v13 }
  0xc9   :  { %241 = vst.msk [vmem:[%s2031_s2 + $0x58] sm:$0xff] %vm15_vm7, %v224_v19 }
  0xce   :  { %761 = vperm.xlu1 %913, %v724_v23   ;;  %758 = vperm.xlu2 %914, %v723_v24   ;;  %v210_v38 = vpop.f32.mrf.mxu3 }
  0xcf   :  { %764 = vperm.xlu0 %915, %v725_v25   ;;  %v146_v25 = vld [vmem:[%s2031_s2 + $0x70] sm:$0xff]  ;;  %v228_v40 = vadd.f32 %v210_v38, %v147_v37 }
  0xd0   :  { %v227_v28 = vadd.f32 %v207_v15, %v146_v25 }
  0xd1   :  { %245 = vst.msk [vmem:[%s2031_s2 + $0x78] sm:$0xff] %vm15_vm7, %v228_v40 }
  0xd2   :  { %244 = vst.msk [vmem:[%s2031_s2 + $0x70] sm:$0xff] %vm15_vm7, %v227_v28 }
  0xd6   :  { %770 = vperm.xlu1 %913, %v727_v29   ;;  %767 = vperm.xlu2 %914, %v726_v30  }
  0xd7   :  { %773 = vperm.xlu0 %915, %v728_v33  }
  0xde   :  { %776 = vperm.xlu2 %914, %v729_v39  }
  0xe0   :  { %v1478_v41 = vpop.permute.xlu2 %731 }
  0xe1   :  { %vm778_vm8 = vcmp.eq.s32.totalorder %v1478_v41, 1 }
  0xe8   :  { %v1480_v44 = vpop.permute.xlu2 %401 }
  0xe9   :  { %917 = vrcp.f32 %v1480_v44  ;;  %v500_v36 = vand.u32 2147483648, %v1480_v44  ;;  %vm494_vm9 = vweird.f32 %v1480_v44  ;;  %v498_v42 = vand.u32 2147483647, %v1480_v44 }
  0xeb   :  { %v501_v49 = vor.u32 1.1754944e-38, %v500_v36  ;;  %vm499_vm13 = vcmp.eq.f32.partialorder %v498_v42, 8.507059e+37 }
  0xef   :  { %v1533_v2 = vpop.eup %917 }
  0xf0   :  { %v1498_v55 = vpop.permute.xlu2 %411  ;;  %v490_v5 = vmul.f32 %v1533_v2, %v1480_v44  ;;  %vm495_vm6 = vweird.f32 %v1533_v2 }
  0xf1   :  { %919 = vrcp.f32 %v1498_v55  ;;  %v530_v43 = vand.u32 2147483648, %v1498_v55  ;;  %vm1599_vm10 = vmor %vm494_vm9, %vm495_vm6  ;;  %v528_v47 = vand.u32 2147483647, %v1498_v55  ;;  %vm524_vm12 = vweird.f32 %v1498_v55 }
  0xf2   :  { %v491_v14 = vsub.f32 1.0, %v490_v5 }
  0xf3   :  { %vm1644_vm15 = vcmp.eq.f32.partialorder %v528_v47, 8.507059e+37 }
  0xf4   :  { %v492_v22 = vmul.f32 %v1533_v2, %v491_v14 }
  0xf6   :  { %v493_v35 = vadd.f32 %v1533_v2, %v492_v22 }
  0xf7   :  { %v1535_v4 = vpop.eup %919 }
  0xf8   :  { %v397_v62 = vpop.permute.xlu1 %396  ;;  %v1524_v63 = vpop.permute.xlu2 %421  ;;  %v520_v16 = vmul.f32 %v1535_v4, %v1498_v55  ;;  %vm525_vm11 = vweird.f32 %v1535_v4  ;;  %v497_v52 = vsel %vm1599_vm10, %v1533_v2, %v493_v35  ;;  %v531_v2 = vor.u32 1.1754944e-38, %v530_v43 }
  0xf9   :  { %921 = vrcp.f32 %v397_v62  ;;  %v485_v18 = vand.u32 2147483648, %v397_v62  ;;  %v483_v21 = vand.u32 2147483647, %v397_v62  ;;  %vm479_vm3 = vweird.f32 %v397_v62  ;;  %vm1634_vm14 = vmor %vm524_vm12, %vm525_vm11 }
  0xfa   :  { %v1543_v8 = vpop.permute.xlu0 %406  ;;  %v521_v23 = vsub.f32 1.0, %v520_v16  ;;  %v560_v51 = vand.u32 2147483648, %v1524_v63  ;;  %v558_v11 = vand.u32 2147483647, %v1524_v63 }
  0xfb   :  { %923 = vrcp.f32 %v1543_v8  ;;  %v486_v27 = vor.u32 1.1754944e-38, %v485_v18  ;;  %vm484_vm5 = vcmp.eq.f32.partialorder %v483_v21, 8.507059e+37  ;;  %v515_v53 = vand.u32 2147483648, %v1543_v8  ;;  %v365_v18 = vld [vmem:[%s2031_s2 + $0x18] sm:$0xff] }
  0xfc   :  { %925 = vrcp.f32 %v1524_v63  ;;  %v522_v33 = vmul.f32 %v1535_v4, %v521_v23  ;;  %v513_v3 = vand.u32 2147483647, %v1543_v8  ;;  %vm509_vm0 = vweird.f32 %v1543_v8 }
  0xfd   :  { %v1660_v15 = vor.u32 1.1754944e-38, %v560_v51  ;;  %vm1715_vm12 = vcmp.eq.f32.partialorder %v558_v11, 8.507059e+37 }
  0xfe   :  { %v523_v44 = vadd.f32 %v1535_v4, %v522_v33  ;;  %vm1673_vm1 = vcmp.eq.f32.partialorder %v513_v3, 8.507059e+37 }
  0xff   :  { %v922_v7 = vpop.eup %921 }
 0x100   :  { %v475_v9 = vmul.f32 %v922_v7, %v397_v62  ;;  %v1545_v10 = vpop.permute.xlu1 %416  ;;  %v1547_v12 = vpop.permute.xlu2 %431  ;;  %vm480_vm2 = vweird.f32 %v922_v7  ;;  %v502_v62 = vsel %vm499_vm13, %v501_v49, %v497_v52  ;;  %v527_v0 = vsel %vm1634_vm14, %v1535_v4, %v523_v44  ;;  %v368_v52 = vld [vmem:[%s2031_s2 + $0x30] sm:$0xff] }
 0x101   :  { %vm481_vm4 = vmor %vm479_vm3, %vm480_vm2  ;;  %927 = vrcp.f32 %v1545_v10  ;;  %v1577_v32 = vpop.eup %923  ;;  %v1655_v13 = vmul.f32 %v502_v62, %v363_v61  ;;  %v1657_v4 = vor.u32 1.1754944e-38, %v515_v53  ;;  %v532_v19 = vsel %vm1644_vm15, %v531_v2, %v527_v0 }
 0x102   :  { %v476_v17 = vsub.f32 1.0, %v475_v9  ;;  %v505_v41 = vmul.f32 %v1577_v32, %v1543_v8  ;;  %v1603_v46 = vpop.eup %925  ;;  %v590_v22 = vand.u32 2147483648, %v1547_v12  ;;  %vm554_vm2 = vweird.f32 %v1524_v63 }
 0x103   :  { %v550_v57 = vmul.f32 %v1603_v46, %v1524_v63  ;;  %vm510_vm3 = vweird.f32 %v1577_v32  ;;  %vm539_vm6 = vweird.f32 %v1545_v10  ;;  %v543_v43 = vand.u32 2147483647, %v1545_v10 }
 0x104   :  { %v477_v20 = vmul.f32 %v922_v7, %v476_v17  ;;  %v506_v58 = vsub.f32 1.0, %v505_v41  ;;  %vm1701_vm9 = vmor %vm509_vm0, %vm510_vm3  ;;  %vm555_vm13 = vweird.f32 %v1603_v46  ;;  %v588_v53 = vand.u32 2147483647, %v1547_v12 }
 0x105   :  { %v551_v14 = vsub.f32 1.0, %v550_v57  ;;  %vm1749_vm0 = vmor %vm554_vm2, %vm555_vm13 }
 0x106   :  { %v478_v24 = vadd.f32 %v922_v7, %v477_v20  ;;  %v507_v16 = vmul.f32 %v1577_v32, %v506_v58  ;;  %v545_v20 = vand.u32 2147483648, %v1545_v10 }
 0x107   :  { %v1615_v48 = vpop.eup %927 }
 0x108   :  { %v482_v6 = vsel %vm481_vm4, %v922_v7, %v478_v24  ;;  %v1567_v29 = vpop.permute.xlu2 %446  ;;  %v1569_v30 = vpop.permute.xlu1 %426  ;;  %v535_v7 = vmul.f32 %v1615_v48, %v1545_v10  ;;  %v508_v36 = vadd.f32 %v1577_v32, %v507_v16  ;;  %v546_v45 = vor.u32 1.1754944e-38, %v545_v20 }
 0x109   :  { %v487_v31 = vsel %vm484_vm5, %v486_v27, %v482_v6  ;;  %929 = vrcp.f32 %v1569_v30  ;;  %v575_v25 = vand.u32 2147483648, %v1569_v30  ;;  %vm540_vm14 = vweird.f32 %v1615_v48 }
 0x10a   :  { %v488_v34 = vmul.f32 %v487_v31, %v362_v26  ;;  %931 = vrcp.f32 %v1547_v12  ;;  %v536_v24 = vsub.f32 1.0, %v535_v7  ;;  %v533_v26 = vmul.f32 %v532_v19, %v365_v18 }
 0x10b   :  { %v573_v31 = vand.u32 2147483647, %v1569_v30  ;;  %v512_v58 = vsel %vm1701_vm9, %v1577_v32, %v508_v36 }
 0x10c   :  { %v794_v39 = vsel %vm778_vm8, %v488_v34, 0.0  ;;  %v552_v34 = vmul.f32 %v1603_v46, %v551_v14  ;;  %vm569_vm8 = vweird.f32 %v1569_v30  ;;  %v537_v42 = vmul.f32 %v1615_v48, %v536_v24 }
 0x10d   :  { %810 = vst.msk [vmem:[%s2031_s2] sm:$0xff] %vm15_vm7, %v794_v39  ;;  %vm574_vm11 = vcmp.eq.f32.partialorder %v573_v31, 8.507059e+37  ;;  %v517_v14 = vsel %vm1673_vm1, %v1657_v4, %v512_v58  ;;  %vm1785_vm1 = vmor %vm539_vm6, %vm540_vm14 }
 0x10e   :  { %v553_v51 = vadd.f32 %v1603_v46, %v552_v34  ;;  %v538_v62 = vadd.f32 %v1615_v48, %v537_v42 }
 0x10f   :  { %v1617_v50 = vpop.eup %929 }
 0x110   :  { %v1622_v54 = vpop.permute.xlu2 %461  ;;  %v1624_v56 = vpop.permute.xlu1 %436  ;;  %v565_v59 = vmul.f32 %v1617_v50, %v1569_v30  ;;  %vm570_vm4 = vweird.f32 %v1617_v50  ;;  %v576_v30 = vor.u32 1.1754944e-38, %v575_v25  ;;  %v557_v16 = vsel %vm1749_vm0, %v1603_v46, %v553_v51  ;;  %v371_v25 = vld [vmem:[%s2031_s2 + $0x48] sm:$0xff] }
 0x111   :  { %v1630_v60 = vpop.permute.xlu0 %441  ;;  %v1649_v5 = vpop.eup %931  ;;  %vm571_vm10 = vmor %vm569_vm8, %vm570_vm4  ;;  %vm584_vm8 = vweird.f32 %v1547_v12  ;;  %v542_v10 = vsel %vm1785_vm1, %v1615_v48, %v538_v62  ;;  %vm599_vm0 = vweird.f32 %v1624_v56  ;;  %v605_v62 = vand.u32 2147483648, %v1624_v56 }
 0x112   :  { %v566_v9 = vsub.f32 1.0, %v565_v59  ;;  %933 = vrcp.f32 %v1630_v60  ;;  %v580_v21 = vmul.f32 %v1649_v5, %v1547_v12  ;;  %v620_v55 = vand.u32 2147483648, %v1630_v60 }
 0x113   :  { %935 = vrcp.f32 %v1624_v56  ;;  %v618_v61 = vand.u32 2147483647, %v1630_v60  ;;  %vm614_vm3 = vweird.f32 %v1630_v60  ;;  %vm585_vm6 = vweird.f32 %v1649_v5 }
 0x114   :  { %v567_v17 = vmul.f32 %v1617_v50, %v566_v9  ;;  %937 = vrcp.f32 %v1567_v29  ;;  %v581_v37 = vsub.f32 1.0, %v580_v21  ;;  %v621_v4 = vor.u32 1.1754944e-38, %v620_v55 }
 0x115   :  { %v1795_v21 = vor.u32 1.1754944e-38, %v590_v22  ;;  %vm619_vm9 = vcmp.eq.f32.partialorder %v618_v61, 8.507059e+37  ;;  %v562_v22 = vsel %vm1715_vm12, %v1660_v15, %v557_v16 }
 0x116   :  { %v568_v6 = vadd.f32 %v1617_v50, %v567_v17 }
 0x118   :  { %v741_v27 = vpop.permute.xlu2 %740  ;;  %v1681_v28 = vpop.permute.xlu1 %451  ;;  %v572_v41 = vsel %vm571_vm10, %v1617_v50, %v568_v6  ;;  %v582_v50 = vmul.f32 %v1649_v5, %v581_v37 }
 0x119   :  { %v1686_v33 = vpop.eup %933  ;;  %vm781_vm5 = vcmp.eq.s32.totalorder %v741_v27, 1  ;;  %v1690_v35 = vpop.permute.xlu0 %456  ;;  %v577_v49 = vsel %vm574_vm11, %v576_v30, %v572_v41 }
 0x11a   :  { %v610_v38 = vmul.f32 %v1686_v33, %v1630_v60  ;;  %v797_v39 = vsel %vm781_vm5, %v533_v26, 0.0  ;;  %939 = vrcp.f32 %v1690_v35  ;;  %v1719_v47 = vpop.eup %935  ;;  %vm615_vm15 = vweird.f32 %v1686_v33  ;;  %v364_v60 = vld [vmem:[%s2031_s2 + $0x10] sm:$0xff] }
 0x11b   :  { %813 = vst.msk [vmem:[%s2031_s2 + $0x18] sm:$0xff] %vm15_vm7, %v797_v39  ;;  %v1733_v59 = vpop.eup %937  ;;  %v595_v0 = vmul.f32 %v1719_v47, %v1624_v56  ;;  %941 = vrcp.f32 %v1681_v28  ;;  %v578_v32 = vmul.f32 %v577_v49, %v368_v52  ;;  %vm616_vm2 = vmor %vm614_vm3, %vm615_vm15  ;;  %vm1789_vm5 = vcmp.eq.f32.partialorder %v543_v43, 8.507059e+37 }
 0x11c   :  { %v611_v8 = vsub.f32 1.0, %v610_v38  ;;  %v1766_v63 = vmul.f32 %v1733_v59, %v1567_v29  ;;  %v518_v27 = vmul.f32 %v517_v14, %v364_v60  ;;  %vm659_vm10 = vweird.f32 %v1690_v35 }
 0x11d   :  { %v596_v23 = vsub.f32 1.0, %v595_v0  ;;  %v665_v34 = vand.u32 2147483648, %v1690_v35  ;;  %v547_v15 = vsel %vm1789_vm5, %v546_v45, %v542_v10  ;;  %v663_v30 = vand.u32 2147483647, %v1690_v35  ;;  %v367_v45 = vld [vmem:[%s2031_s2 + $0x28] sm:$0xff] }
 0x11e   :  { %v612_v57 = vmul.f32 %v1686_v33, %v611_v8  ;;  %v626_v31 = vsub.f32 1.0, %v1766_v63  ;;  %v563_v55 = vmul.f32 %v562_v22, %v367_v45  ;;  %vm600_vm5 = vweird.f32 %v1719_v47 }
 0x11f   :  { %v597_v37 = vmul.f32 %v1719_v47, %v596_v23  ;;  %vm664_vm3 = vcmp.eq.f32.partialorder %v663_v30, 8.507059e+37  ;;  %v376_v23 = vld [vmem:[%s2031_s2 + $0x70] sm:$0xff] }
 0x120   :  { %v1742_v1 = vpop.permute.xlu1 %466  ;;  %v750_v2 = vpop.permute.xlu2 %749  ;;  %v613_v3 = vadd.f32 %v1686_v33, %v612_v57  ;;  %v627_v7 = vmul.f32 %v1733_v59, %v626_v31 }
 0x121   :  { %v1753_v9 = vpop.eup %939  ;;  %vm784_vm4 = vcmp.eq.s32.totalorder %v750_v2, 1  ;;  %v1756_v11 = vpop.permute.xlu0 %471  ;;  %v374_v2 = vld [vmem:[%s2031_s2 + $0x60] sm:$0xff]  ;;  %v598_v12 = vadd.f32 %v1719_v47, %v597_v37 }
 0x122   :  { %v655_v17 = vmul.f32 %v1753_v9, %v1690_v35  ;;  %v800_v18 = vsel %vm784_vm4, %v578_v32, 0.0  ;;  %943 = vrcp.f32 %v1756_v11  ;;  %v617_v46 = vsel %vm616_vm2, %v1686_v33, %v613_v3  ;;  %v1808_v6 = vpop.eup %941  ;;  %vm1879_vm2 = vmor %vm584_vm8, %vm585_vm6 }
 0x123   :  { %816 = vst.msk [vmem:[%s2031_s2 + $0x30] sm:$0xff] %vm15_vm7, %v800_v18  ;;  %v622_v26 = vsel %vm619_vm9, %v621_v4, %v617_v46  ;;  %945 = vrcp.f32 %v1622_v54  ;;  %v1814_v33 = vadd.f32 %v1649_v5, %v582_v50  ;;  %vm660_vm11 = vweird.f32 %v1753_v9 }
 0x124   :  { %v656_v24 = vsub.f32 1.0, %v655_v17  ;;  %v623_v40 = vmul.f32 %v622_v26, %v371_v25  ;;  %v640_v43 = vmul.f32 %v1808_v6, %v1681_v28  ;;  %947 = vrcp.f32 %v1742_v1  ;;  %vm1839_vm15 = vmor %vm659_vm10, %vm660_vm11 }
 0x125   :  { %v666_v35 = vor.u32 1.1754944e-38, %v665_v34  ;;  %vm1862_vm4 = vcmp.eq.f32.partialorder %v588_v53, 8.507059e+37  ;;  %v587_v14 = vsel %vm1879_vm2, %v1649_v5, %v1814_v33  ;;  %v710_v16 = vand.u32 2147483648, %v1756_v11 }
 0x126   :  { %v657_v48 = vmul.f32 %v1753_v9, %v656_v24  ;;  %v641_v0 = vsub.f32 1.0, %v640_v43  ;;  %vm704_vm8 = vweird.f32 %v1756_v11  ;;  %v708_v4 = vand.u32 2147483647, %v1756_v11 }
 0x127   :  { %v603_v24 = vand.u32 2147483647, %v1624_v56  ;;  %v711_v31 = vor.u32 1.1754944e-38, %v710_v16  ;;  %v369_v56 = vld [vmem:[%s2031_s2 + $0x38] sm:$0xff]  ;;  %v592_v34 = vsel %vm1862_vm4, %v1795_v21, %v587_v14  ;;  %v370_v21 = vld [vmem:[%s2031_s2 + $0x40] sm:$0xff]  ;;  %vm644_vm4 = vweird.f32 %v1681_v28 }
 0x128   :  { %v1821_v36 = vpop.eup %943  ;;  %v735_v38 = vpop.permute.xlu1 %734  ;;  %v658_v42 = vadd.f32 %v1753_v9, %v657_v48  ;;  %v642_v19 = vmul.f32 %v1808_v6, %v641_v0  ;;  %v593_v30 = vmul.f32 %v592_v34, %v369_v56  ;;  %v680_v53 = vand.u32 2147483648, %v1622_v54 }
 0x129   :  { %v759_v39 = vpop.permute.xlu2 %758  ;;  %v700_v8 = vmul.f32 %v1821_v36, %v1756_v11  ;;  %vm779_vm12 = vcmp.eq.s32.totalorder %v735_v38, 1  ;;  %v738_v41 = vpop.permute.xlu0 %737  ;;  %vm705_vm1 = vweird.f32 %v1821_v36 }
 0x12a   :  { %vm787_vm13 = vcmp.eq.s32.totalorder %v759_v39, 1  ;;  %v795_v44 = vsel %vm779_vm12, %v1655_v13, 0.0  ;;  %vm780_vm14 = vcmp.eq.s32.totalorder %v738_v41, 1  ;;  %v366_v13 = vld [vmem:[%s2031_s2 + $0x20] sm:$0xff]  ;;  %v662_v57 = vsel %vm1839_vm15, %v1753_v9, %v658_v42  ;;  %v1853_v58 = vpop.eup %945  ;;  %vm1902_vm10 = vmor %vm704_vm8, %vm705_vm1 }
 0x12b   :  { %v803_v52 = vsel %vm787_vm13, %v623_v40, 0.0  ;;  %v701_v51 = vsub.f32 1.0, %v700_v8  ;;  %811 = vst.msk [vmem:[%s2031_s2 + $0x8] sm:$0xff] %vm15_vm7, %v795_v44  ;;  %v796_v50 = vsel %vm780_vm14, %v518_v27, 0.0  ;;  %v667_v3 = vsel %vm664_vm3, %v666_v35, %v662_v57  ;;  %v1893_v17 = vpop.eup %947  ;;  %vm1914_vm12 = vmor %vm599_vm0, %vm600_vm5 }
 0x12c   :  { %819 = vst.msk [vmem:[%s2031_s2 + $0x48] sm:$0xff] %vm15_vm7, %v803_v52  ;;  %v548_v9 = vmul.f32 %v547_v15, %v366_v13  ;;  %v670_v18 = vmul.f32 %v1853_v58, %v1622_v54  ;;  %v668_v5 = vmul.f32 %v667_v3, %v374_v2  ;;  %v685_v27 = vmul.f32 %v1893_v17, %v1742_v1 }
 0x12d   :  { %v702_v32 = vmul.f32 %v1821_v36, %v701_v51  ;;  %812 = vst.msk [vmem:[%s2031_s2 + $0x10] sm:$0xff] %vm15_vm7, %v796_v50  ;;  %v602_v48 = vsel %vm1914_vm12, %v1719_v47, %v598_v12  ;;  %vm709_vm13 = vcmp.eq.f32.partialorder %v708_v4, 8.507059e+37  ;;  %v606_v15 = vor.u32 1.1754944e-38, %v605_v62 }
 0x12e   :  { %v671_v33 = vsub.f32 1.0, %v670_v18  ;;  %vm629_vm14 = vweird.f32 %v1567_v29  ;;  %v635_v47 = vand.u32 2147483648, %v1567_v29  ;;  %vm604_vm15 = vcmp.eq.f32.partialorder %v603_v24, 8.507059e+37 }
 0x12f   :  { %v703_v63 = vadd.f32 %v1821_v36, %v702_v32  ;;  %v607_v38 = vsel %vm604_vm15, %v606_v15, %v602_v48  ;;  %v628_v39 = vadd.f32 %v1733_v59, %v627_v7  ;;  %vm630_vm0 = vweird.f32 %v1733_v59 }
 0x130   :  { %v744_v60 = vpop.permute.xlu1 %743  ;;  %v633_v40 = vand.u32 2147483647, %v1567_v29  ;;  %v686_v42 = vsub.f32 1.0, %v685_v27  ;;  %v643_v43 = vadd.f32 %v1808_v6, %v642_v19  ;;  %vm645_vm3 = vweird.f32 %v1808_v6  ;;  %vm1961_vm5 = vmor %vm629_vm14, %vm630_vm0 }
 0x131   :  { %v768_v46 = vpop.permute.xlu2 %767  ;;  %vm782_vm9 = vcmp.eq.s32.totalorder %v744_v60, 1  ;;  %v747_v20 = vpop.permute.xlu0 %746  ;;  %v707_v11 = vsel %vm1902_vm10, %v1821_v36, %v703_v63  ;;  %v377_v36 = vld [vmem:[%s2031_s2 + $0x78] sm:$0xff]  ;;  %v672_v8 = vmul.f32 %v1853_v58, %v671_v33  ;;  %v650_v41 = vand.u32 2147483648, %v1681_v28 }
 0x132   :  { %vm790_vm6 = vcmp.eq.s32.totalorder %v768_v46, 1  ;;  %v798_v10 = vsel %vm782_vm9, %v548_v9, 0.0  ;;  %vm783_vm11 = vcmp.eq.s32.totalorder %v747_v20, 1  ;;  %v712_v37 = vsel %vm709_vm13, %v711_v31, %v707_v11  ;;  %vm646_vm9 = vmor %vm644_vm4, %vm645_vm3 }
 0x133   :  { %v806_v25 = vsel %vm790_vm6, %v668_v5, 0.0  ;;  %814 = vst.msk [vmem:[%s2031_s2 + $0x20] sm:$0xff] %vm15_vm7, %v798_v10  ;;  %v799_v22 = vsel %vm783_vm11, %v563_v55, 0.0  ;;  %v713_v52 = vmul.f32 %v712_v37, %v377_v36  ;;  %v608_v49 = vmul.f32 %v607_v38, %v370_v21 }
 0x134   :  { %822 = vst.msk [vmem:[%s2031_s2 + $0x60] sm:$0xff] %vm15_vm7, %v806_v25  ;;  %v648_v13 = vand.u32 2147483647, %v1681_v28  ;;  %v632_v55 = vsel %vm1961_vm5, %v1733_v59, %v628_v39  ;;  %v687_v29 = vmul.f32 %v1893_v17, %v686_v42  ;;  %v636_v62 = vor.u32 1.1754944e-38, %v635_v47  ;;  %v372_v28 = vld [vmem:[%s2031_s2 + $0x50] sm:$0xff] }
 0x135   :  { %815 = vst.msk [vmem:[%s2031_s2 + $0x28] sm:$0xff] %vm15_vm7, %v799_v22  ;;  %v647_v0 = vsel %vm646_vm9, %v1808_v6, %v643_v43  ;;  %vm634_vm6 = vcmp.eq.f32.partialorder %v633_v40, 8.507059e+37  ;;  %v651_v59 = vor.u32 1.1754944e-38, %v650_v41  ;;  %v373_v6 = vld [vmem:[%s2031_s2 + $0x58] sm:$0xff]  ;;  %v673_v3 = vadd.f32 %v1853_v58, %v672_v8 }
 0x136   :  { %v637_v32 = vsel %vm634_vm6, %v636_v62, %v632_v55  ;;  %vm649_vm10 = vcmp.eq.f32.partialorder %v648_v13, 8.507059e+37  ;;  %vm675_vm11 = vweird.f32 %v1853_v58  ;;  %v688_v7 = vadd.f32 %v1893_v17, %v687_v29 }
 0x137   :  { %v652_v2 = vsel %vm649_vm10, %v651_v59, %v647_v0  ;;  %vm690_vm12 = vweird.f32 %v1893_v17  ;;  %vm674_vm13 = vweird.f32 %v1622_v54  ;;  %v695_v9 = vand.u32 2147483648, %v1742_v1 }
 0x138   :  { %v753_v45 = vpop.permute.xlu1 %752  ;;  %v638_v14 = vmul.f32 %v637_v32, %v372_v28  ;;  %v678_v63 = vand.u32 2147483647, %v1622_v54  ;;  %vm689_vm14 = vweird.f32 %v1742_v1  ;;  %v653_v12 = vmul.f32 %v652_v2, %v373_v6  ;;  %vm676_vm0 = vmor %vm674_vm13, %vm675_vm11 }
 0x139   :  { %v777_v44 = vpop.permute.xlu2 %776  ;;  %vm785_vm2 = vcmp.eq.s32.totalorder %v753_v45, 1  ;;  %v756_v51 = vpop.permute.xlu0 %755  ;;  %v693_v60 = vand.u32 2147483647, %v1742_v1  ;;  %v677_v5 = vsel %vm676_vm0, %v1853_v58, %v673_v3  ;;  %vm691_vm4 = vmor %vm689_vm14, %vm690_vm12  ;;  %v681_v4 = vor.u32 1.1754944e-38, %v680_v53  ;;  %v375_v58 = vld [vmem:[%s2031_s2 + $0x68] sm:$0xff] }
 0x13a   :  { %vm793_vm1 = vcmp.eq.s32.totalorder %v777_v44, 1  ;;  %v801_v57 = vsel %vm785_vm2, %v593_v30, 0.0  ;;  %vm786_vm8 = vcmp.eq.s32.totalorder %v756_v51, 1  ;;  %v692_v19 = vsel %vm691_vm4, %v1893_v17, %v688_v7 }
 0x13b   :  { %v809_v35 = vsel %vm793_vm1, %v713_v52, 0.0  ;;  %817 = vst.msk [vmem:[%s2031_s2 + $0x38] sm:$0xff] %vm15_vm7, %v801_v57  ;;  %v802_v61 = vsel %vm786_vm8, %v608_v49, 0.0  ;;  %vm679_vm2 = vcmp.eq.f32.partialorder %v678_v63, 8.507059e+37  ;;  %v696_v1 = vor.u32 1.1754944e-38, %v695_v9 }
 0x13c   :  { %825 = vst.msk [vmem:[%s2031_s2 + $0x78] sm:$0xff] %vm15_vm7, %v809_v35  ;;  %v682_v20 = vsel %vm679_vm2, %v681_v4, %v677_v5  ;;  %vm694_vm1 = vcmp.eq.f32.partialorder %v693_v60, 8.507059e+37 }
 0x13d   :  { %818 = vst.msk [vmem:[%s2031_s2 + $0x40] sm:$0xff] %vm15_vm7, %v802_v61  ;;  %v697_v24 = vsel %vm694_vm1, %v696_v1, %v692_v19  ;;  %v683_v10 = vmul.f32 %v682_v20, %v375_v58 }
 0x13e   :  { %v698_v25 = vmul.f32 %v697_v24, %v376_v23 }
 0x140   :  { %v762_v16 = vpop.permute.xlu1 %761 }
 0x141   :  { %vm788_vm15 = vcmp.eq.s32.totalorder %v762_v16, 1  ;;  %v765_v18 = vpop.permute.xlu0 %764 }
 0x142   :  { %v804_v46 = vsel %vm788_vm15, %v638_v14, 0.0  ;;  %vm789_vm3 = vcmp.eq.s32.totalorder %v765_v18, 1 }
 0x143   :  { %820 = vst.msk [vmem:[%s2031_s2 + $0x50] sm:$0xff] %vm15_vm7, %v804_v46  ;;  %v805_v54 = vsel %vm789_vm3, %v653_v12, 0.0 }
 0x144   :  { %821 = vst.msk [vmem:[%s2031_s2 + $0x58] sm:$0xff] %vm15_vm7, %v805_v54 }
 0x148   :  { %v771_v17 = vpop.permute.xlu1 %770 }
 0x149   :  { %vm791_vm5 = vcmp.eq.s32.totalorder %v771_v17, 1  ;;  %v774_v11 = vpop.permute.xlu0 %773 }
 0x14a   :  { %v807_v26 = vsel %vm791_vm5, %v683_v10, 0.0  ;;  %vm792_vm8 = vcmp.eq.s32.totalorder %v774_v11, 1 }
 0x14b   :  { %823 = vst.msk [vmem:[%s2031_s2 + $0x68] sm:$0xff] %vm15_vm7, %v807_v26  ;;  %v808_v27 = vsel %vm792_vm8, %v698_v25, 0.0 }
 0x14c   :  { %824 = vst.msk [vmem:[%s2031_s2 + $0x70] sm:$0xff] %vm15_vm7, %v808_v27 }

</bundles_post_ra>
